<compile_context>
chip_gen: v6e
topology: v6e:2x2x1
jax: 0.10.0
libtpu: 0.0.40
codegen_flags: <defaults>
</compile_context>

<pallas_src>
import math

import jax
import jax.numpy as jnp
from jax.experimental import pallas as pl
from jax.experimental.pallas import tpu as pltpu

INPUT_SIZE = 3
HIDDEN_SIZE = 6
OUTPUT_SIZE = 1

# VMEM bytes per batch column of the pipelined tiles:
#   x tile   [3, TB] f32, sublane-padded 3 -> 8 : 32 B/col
#   out tile [1, TB] f32, sublane-padded 1 -> 8 : 32 B/col
# each double-buffered by the BlockSpec pipeline -> 2 * (32 + 32) = 128 B/col.
_COL_BYTES = 2 * (8 + 8) * 4


def _mlp_kernel(x_ref, w1_ref, b1_ref, w2_ref, b2_ref, o_ref):
    # x_ref : [INPUT_SIZE, TB]   (batch in lanes)
    # w1_ref: [HIDDEN_SIZE, INPUT_SIZE], b1_ref: [HIDDEN_SIZE, 1]
    # w2_ref: [OUTPUT_SIZE, HIDDEN_SIZE], b2_ref: [OUTPUT_SIZE, 1]
    h = jnp.dot(w1_ref[...], x_ref[...], preferred_element_type=jnp.float32)  # [HID, TB]
    h = jnp.maximum(h + b1_ref[...], 0.0)                                     # ReLU, bias bcast over lanes
    o = jnp.dot(w2_ref[...], h, preferred_element_type=jnp.float32)           # [OUT, TB]
    o_ref[...] = (o + b2_ref[...]).astype(o_ref.dtype)


def _round_up(x, m):
    return ((x + m - 1) // m) * m


def _vmem_capacity_bytes():
    """Physical VMEM per TensorCore; conservative fallback if query fails."""
    try:
        info = pltpu.get_tpu_info()
        cap = getattr(info, "vmem_capacity_bytes", None)
        if cap:
            return int(cap)
    except Exception:
        pass
    return 64 * 1024 * 1024  # v7x has the smallest per-TC VMEM


def _auto_batch_tile(B, vmem_cap):
    """Largest 128-multiple tile keeping double-buffered x+out under ~half of VMEM,
    while producing >= 2 grid steps so both v7x TensorCores get work."""
    tb_cap = max(128, (((vmem_cap // 2) // _COL_BYTES) // 128) * 128)
    if B <= 256:
        return B  # single tiny tile; block == full array dim so any size is legal
    n_tiles = max(2, pl.cdiv(B, tb_cap))
    return min(tb_cap, _round_up(pl.cdiv(B, n_tiles), 128))


def linear_regression_forward_tm(x_t, w1, b1, w2, b2, *,
                                 block_batch=None, compute_dtype=None):
    """Preferred (feature-major) entry point.

    x_t : [INPUT_SIZE, B]  -> returns [OUTPUT_SIZE, B].
    No host-side transpose/copy of x; batch lives in the lane dimension so all
    loads and stores are lane-dense.
    """
    in_dim, B = x_t.shape
    assert in_dim == INPUT_SIZE

    vmem_cap = _vmem_capacity_bytes()
    if block_batch is None:
        TB = _auto_batch_tile(B, vmem_cap)
    else:
        TB = min(int(block_batch), B)
        if TB < B:
            TB = max(128, (TB // 128) * 128)  # partial tiles need 128-aligned lanes

    grid = (pl.cdiv(B, TB),)
    # Explicit scoped-VMEM limit: sized for the tiles (+headroom), capped below
    # physical VMEM.  Needed on v5e (16 MiB default) for the large-tile path.
    vmem_limit = int(min(vmem_cap - (4 << 20), _COL_BYTES * TB + (16 << 20)))

    if compute_dtype is not None:
        x_t = x_t.astype(compute_dtype)
        w1 = w1.astype(compute_dtype)
        w2 = w2.astype(compute_dtype)

    b1c = b1.reshape(HIDDEN_SIZE, 1).astype(jnp.float32)
    b2c = b2.reshape(OUTPUT_SIZE, 1).astype(jnp.float32)

    # Weights/biases: constant block index -> DMA'd once, VMEM-resident across tiles.
    const = lambda arr: pl.BlockSpec(arr.shape, lambda i: (0, 0))

    out_t = pl.pallas_call(
        _mlp_kernel,
        out_shape=jax.ShapeDtypeStruct((OUTPUT_SIZE, B), jnp.float32),
        grid=grid,
        in_specs=[
            pl.BlockSpec((INPUT_SIZE, TB), lambda i: (0, i)),  # x^T tiled over batch lanes
            const(w1),
            const(b1c),
            const(w2),
            const(b2c),
        ],
        out_specs=pl.BlockSpec((OUTPUT_SIZE, TB), lambda i: (0, i)),
        compiler_params=pltpu.CompilerParams(
            dimension_semantics=("parallel",),  # shard batch tiles across TCs (v7x)
            vmem_limit_bytes=vmem_limit,
        ),
    )(x_t, w1, b1c, w2, b2c)
    return out_t


def linear_regression_forward(x, w1, b1, w2, b2, *,
                              block_batch=None, compute_dtype=None,
                              min_pallas_batch=0):
    """PyTorch-layout wrapper: x [B, INPUT_SIZE] -> [B, OUTPUT_SIZE].

    NOTE: this materializes x.T (one extra HBM pass over x).  Callers that can
    store activations feature-major should use `linear_regression_forward_tm`.
    In production, set min_pallas_batch ~ 4096: below that the fixed
    pallas_call + transpose overhead makes a fused jnp expression as fast.
    """
    B = x.shape[0]
    if B < min_pallas_batch:
        h = jnp.maximum(x @ w1.T + b1, 0.0)
        return h @ w2.T + b2

    out_t = linear_regression_forward_tm(
        x.T, w1, b1, w2, b2, block_batch=block_batch, compute_dtype=compute_dtype)
    # [1, B] -> [B, 1] is byte-identical in row-major: lowers to a bitcast/reshape.
    return out_t.reshape(B, OUTPUT_SIZE)


def init_params(key):
    """Deterministic parameter init matching the PyTorch module's __init__."""
    k1, k2, k3 = jax.random.split(key, 3)
    gain = math.sqrt(2.0)

    # xavier_uniform(linear.weight, gain=sqrt(2)): bound = gain*sqrt(6/(fan_in+fan_out))
    bound1 = gain * math.sqrt(6.0 / (INPUT_SIZE + HIDDEN_SIZE))
    w1 = jax.random.uniform(k1, (HIDDEN_SIZE, INPUT_SIZE), jnp.float32,
                            minval=-bound1, maxval=bound1)
    # init.constant(linear.bias, 0)
    b1 = jnp.zeros((HIDDEN_SIZE,), jnp.float32)

    bound2 = gain * math.sqrt(6.0 / (HIDDEN_SIZE + OUTPUT_SIZE))
    w2 = jax.random.uniform(k2, (OUTPUT_SIZE, HIDDEN_SIZE), jnp.float32,
                            minval=-bound2, maxval=bound2)
    # linear2.bias keeps PyTorch's default uniform(-1/sqrt(fan_in), 1/sqrt(fan_in)) init
    bb = 1.0 / math.sqrt(HIDDEN_SIZE)
    b2 = jax.random.uniform(k3, (OUTPUT_SIZE,), jnp.float32, minval=-bb, maxval=bb)
    return w1, b1, w2, b2


def reference_forward(x, w1, b1, w2, b2):
    h = jnp.maximum(x @ w1.T + b1, 0.0)
    return h @ w2.T + b2


if __name__ == "__main__":
    key = jax.random.PRNGKey(0)
    kx, kx2, kx3, kp = jax.random.split(key, 4)
    w1, b1, w2, b2 = init_params(kp)

    # 1) Small single-tile case through the PyTorch-layout wrapper.
    B = 8
    x = jax.random.normal(kx, (B, INPUT_SIZE), jnp.float32)
    out = jax.block_until_ready(linear_regression_forward(x, w1, b1, w2, b2))
    ref = reference_forward(x, w1, b1, w2, b2)
    assert out.shape == (B, OUTPUT_SIZE)
    assert jnp.allclose(out, ref, atol=1e-5, rtol=1e-5)

    # 2) Multi-tile, evenly divisible batch through the feature-major entry point
    #    (no transpose anywhere; exercises the 2-tile "parallel" grid).
    B2 = 256
    x2 = jax.random.normal(kx2, (B2, INPUT_SIZE), jnp.float32)
    out2_t = jax.block_until_ready(
        linear_regression_forward_tm(x2.T, w1, b1, w2, b2, block_batch=128))
    ref2 = reference_forward(x2, w1, b1, w2, b2)
    assert out2_t.shape == (OUTPUT_SIZE, B2)
    assert jnp.allclose(out2_t.reshape(B2, OUTPUT_SIZE), ref2, atol=1e-5, rtol=1e-5)

    # 3) Non-divisible batch: exercises the partial last block (handled by
    #    Pallas; duplicate/padded writes are benign and identical).
    B3 = 300
    x3 = jax.random.normal(kx3, (B3, INPUT_SIZE), jnp.float32)
    out3 = jax.block_until_ready(
        linear_regression_forward(x3, w1, b1, w2, b2, block_batch=128))
    ref3 = reference_forward(x3, w1, b1, w2, b2)
    assert out3.shape == (B3, OUTPUT_SIZE)
    assert jnp.allclose(out3, ref3, atol=1e-5, rtol=1e-5)

    print("KERNEL_OK")
</pallas_src>

<mosaic_0001>
module attributes {stable_mosaic.version = 11 : i64} {
  func.func @_mlp_kernel(%arg0: i32, %arg1: memref<3x8xf32, #tpu.memory_space<vmem>>, %arg2: memref<6x3xf32, #tpu.memory_space<vmem>>, %arg3: memref<6x1xf32, #tpu.memory_space<vmem>>, %arg4: memref<1x6xf32, #tpu.memory_space<vmem>>, %arg5: memref<1x1xf32, #tpu.memory_space<vmem>>, %arg6: memref<1x8xf32, #tpu.memory_space<vmem>>) attributes {dimension_semantics = [#tpu.dimension_semantics<parallel>], iteration_bounds = array<i64: 1>, scalar_prefetch = 0 : i64, scratch_operands = 0 : i64, tpu.core_type = #tpu.core_type<tc>, window_params = [{transform_indices = @transform_0, window_bounds = array<i64: 3, 8>}, {pipeline_mode = #tpu.pipeline_mode<synchronous>, transform_indices = @transform_1, window_bounds = array<i64: 6, 3>}, {pipeline_mode = #tpu.pipeline_mode<synchronous>, transform_indices = @transform_2, window_bounds = array<i64: 6, 1>}, {pipeline_mode = #tpu.pipeline_mode<synchronous>, transform_indices = @transform_3, window_bounds = array<i64: 1, 6>}, {pipeline_mode = #tpu.pipeline_mode<synchronous>, transform_indices = @transform_4, window_bounds = array<i64: 1, 1>}, {transform_indices = @transform_5, window_bounds = array<i64: 1, 8>}]} {
    %c0 = arith.constant 0 : index
    %c0_0 = arith.constant 0 : index
    %0 = vector.load %arg2[%c0, %c0_0] : memref<6x3xf32, #tpu.memory_space<vmem>>, vector<6x3xf32>
    %c0_1 = arith.constant 0 : index
    %c0_2 = arith.constant 0 : index
    %1 = vector.load %arg1[%c0_1, %c0_2] : memref<3x8xf32, #tpu.memory_space<vmem>>, vector<3x8xf32>
    %cst = arith.constant dense<0.000000e+00> : vector<6x8xf32>
    %2 = tpu.matmul %0, %1, %cst {dimension_numbers = #tpu.dot_dimension_numbers<[1], [0], [0], [1], [0, 0, 1, 1], [], []>} : vector<6x3xf32>, vector<3x8xf32>, vector<6x8xf32> -> vector<6x8xf32>
    %c0_3 = arith.constant 0 : index
    %c0_4 = arith.constant 0 : index
    %3 = vector.load %arg3[%c0_3, %c0_4] : memref<6x1xf32, #tpu.memory_space<vmem>>, vector<6x1xf32>
    %4 = vector.broadcast %3 : vector<6x1xf32> to vector<6x8xf32>
    %5 = arith.addf %2, %4 : vector<6x8xf32>
    %cst_5 = arith.constant 0.000000e+00 : f32
    %6 = vector.broadcast %cst_5 : f32 to vector<6x8xf32>
    %7 = arith.maximumf %5, %6 : vector<6x8xf32>
    %c0_6 = arith.constant 0 : index
    %c0_7 = arith.constant 0 : index
    %8 = vector.load %arg4[%c0_6, %c0_7] : memref<1x6xf32, #tpu.memory_space<vmem>>, vector<1x6xf32>
    %cst_8 = arith.constant dense<0.000000e+00> : vector<1x8xf32>
    %9 = tpu.matmul %8, %7, %cst_8 {dimension_numbers = #tpu.dot_dimension_numbers<[1], [0], [0], [1], [0, 0, 1, 1], [], []>} : vector<1x6xf32>, vector<6x8xf32>, vector<1x8xf32> -> vector<1x8xf32>
    %c0_9 = arith.constant 0 : index
    %c0_10 = arith.constant 0 : index
    %10 = vector.load %arg5[%c0_9, %c0_10] : memref<1x1xf32, #tpu.memory_space<vmem>>, vector<1x1xf32>
    %11 = vector.broadcast %10 : vector<1x1xf32> to vector<1x8xf32>
    %12 = arith.addf %9, %11 : vector<1x8xf32>
    %c0_11 = arith.constant 0 : index
    %c0_12 = arith.constant 0 : index
    %13 = vector.load %arg6[%c0_11, %c0_12] : memref<1x8xf32, #tpu.memory_space<vmem>>, vector<1x8xf32>
    tpu.vector_store %arg6[%c0_11, %c0_12], %12 {strides = array<i32>} : memref<1x8xf32, #tpu.memory_space<vmem>>, vector<1x8xf32>,
    return
  }
  func.func @transform_0(%arg0: i32) -> (i32, i32) {
    %c0_i32 = arith.constant 0 : i32
    %c0_i32_0 = arith.constant 0 : i32
    return %c0_i32, %arg0 : i32, i32
  }
  func.func @transform_1(%arg0: i32) -> (i32, i32) {
    %c0_i32 = arith.constant 0 : i32
    %c0_i32_0 = arith.constant 0 : i32
    %c0_i32_1 = arith.constant 0 : i32
    return %c0_i32, %c0_i32_0 : i32, i32
  }
  func.func @transform_2(%arg0: i32) -> (i32, i32) {
    %c0_i32 = arith.constant 0 : i32
    %c0_i32_0 = arith.constant 0 : i32
    %c0_i32_1 = arith.constant 0 : i32
    return %c0_i32, %c0_i32_0 : i32, i32
  }
  func.func @transform_3(%arg0: i32) -> (i32, i32) {
    %c0_i32 = arith.constant 0 : i32
    %c0_i32_0 = arith.constant 0 : i32
    %c0_i32_1 = arith.constant 0 : i32
    return %c0_i32, %c0_i32_0 : i32, i32
  }
  func.func @transform_4(%arg0: i32) -> (i32, i32) {
    %c0_i32 = arith.constant 0 : i32
    %c0_i32_0 = arith.constant 0 : i32
    %c0_i32_1 = arith.constant 0 : i32
    return %c0_i32, %c0_i32_0 : i32, i32
  }
  func.func @transform_5(%arg0: i32) -> (i32, i32) {
    %c0_i32 = arith.constant 0 : i32
    %c0_i32_0 = arith.constant 0 : i32
    return %c0_i32, %arg0 : i32, i32
  }
}

</mosaic_0001>

<bundles_post_ra>
// kernel: tpu_custom_call.1
= control target key start
LH: loop header
LB: loop body
LE: loop exit
PB: predicated region body
PF: predicated region fallthrough
CT: control target
= control target key end

     0   :  { %s312_s0 = inlined_call_operand.vmem [shape: f32[3,8], index: 0, kind: input, shape index: {}]   ;;  %s313_s1 = inlined_call_operand.vmem [shape: f32[6,3], index: 1, kind: input, shape index: {}]   ;;  %s314_s2 = inlined_call_operand.vmem [shape: f32[6,1], index: 2, kind: input, shape index: {}]   ;;  %s315_s3 = inlined_call_operand.vmem [shape: f32[1,6], index: 3, kind: input, shape index: {}]   ;;  %s316_s4 = inlined_call_operand.<no memory space> [shape: f32[1,1], index: 4, kind: input, shape index: {}]   ;;  %s317_s5 = inlined_call_operand.hbm [shape: f32[1,8], index: 5, kind: output, shape index: {}]  }
   0x1   :  { %v10_v0 = vstv %s316_s4 }
   0x2   :  { %11 = vst [vmem:[#allocation2] sm:$0x1] %v10_v0 }
   0x3   :  { %v24_v1 = vld [vmem:[%s312_s0] sm:$0x7]  ;;  %vm35_vm0 = vcmask 1042432   ;;  %vm31_vm1 = vcmask 23552   ;;  %v260_v2 = vmov 0.0   ;;  %vm261_vm2 = vmmov 0  }
   0x4   :  { %223 = vmatprep.subr.mxu0 %v260_v2  ;;  %225 = vmatprep.mubr.msk.f32.mxu0 %vm261_vm2, %v260_v2  ;;  %v23_v3 = vld [vmem:[%s313_s1] sm:$0x3f]  ;;  %v262_v5 = vmov 0  }
   0x5   :  { %v25_v4 = vld [vmem:[%s314_s2] sm:$0x3f]  ;;  %224 = vmatpush3.msk.msra.mxu0 %vm35_vm0, %v24_v1  ;;  %237 = vset.pattern.permute.xlu0 %v262_v5 }
   0x6   :  { %12 = vsyncpa [#allocation4], 0  ;;  %226 = vmatmul.mubr.msk.f32.vlgmr.msra.gmra.mxu0 %vm31_vm1, %v23_v3  ;;  %28 = vperm.xlu0 %237, %v25_v4   ;;  %vm125_vm3 = vcmask 1045504   ;;  %v110_v12 = vld [vmem:[%s315_s3] sm:$0x1]  ;;  %vm121_vm4 = vcmask 48128   ;;  %v117_v13 = vlaneseq }
   0x7   :  { %228 = vmatprep.subr.mxu1 %v260_v2  ;;  %230 = vmatprep.mubr.msk.f32.mxu1 %vm261_vm2, %v260_v2  ;;  %s263_s2 = smov [#allocation3]   ;;  %vm199_vm5 = vcmask 57344  }
   0x8   :  { %v118_v14 = vshrl.u32 %v117_v13, 7  ;;  %s207_s4 = sshll.u32 %s263_s2, 4  ;;  %s208_s4 = int_to_ptr.vmem [resolvable:$true] %s207_s4 }
   0x9   :  { %v111_v6 = vld [vmem:[#allocation2] sm:$0x1]  ;;  %s238_s26 = scalar_lea.vmem %s208_s4, 16  ;;  %s242_s27 = scalar_lea.vmem %s208_s4, 32 }
   0xa   :  { %114 = vperm.xlu0 %237, %v111_v6   ;;  %v119_v15 = vsub.s32 0, %v118_v14  ;;  %p239_p0 = scmp.ne.s32.totalorder %s208_s4, %s238_s26  ;;  %p243_p1 = scmp.lt.s32.totalorder %s208_s4, %s208_s4 }
   0xb   :  { %p244_p2 = scmp.lt.s32.totalorder %s242_s27, %s238_s26 }
   0xd   :  { %p245_p3 = por %p244_p2, %p243_p1 }
   0xf   :  { %p246_p4 = pnand %p245_p3, %p239_p0 }
  0x81   :  { %v29_v7 = vpop.permute.xlu0 %28 }
  0x85   :  { %v115_v16 = vpop.permute.xlu0 %114 }
  0x86   :  { %v120_v17 = vrot.slane %v115_v16, %v119_v15 }
  0xc6   :  { %v105_v8 = vpop.f32.mrf.mxu0 }
  0xc7   :  { %v106_v9 = vadd.f32 %v105_v8, %v29_v7 }
  0xc8   :  { %v227_v10 = vpop.f32.mrf.mxu0 }
  0xc9   :  { %v109_v11 = vmax.f32 %v106_v9, 0.0 }
  0xcb   :  { %229 = vmatpush3.msk.msra.mxu1 %vm125_vm3, %v109_v11 }
  0xcc   :  { %231 = vmatmul.mubr.msk.f32.vlgmr.msra.gmra.mxu1 %vm121_vm4, %v110_v12 }
 0x18c   :  { %v195_v18 = vpop.f32.mrf.mxu1 }
 0x18d   :  { %v196_v19 = vadd.f32 %v195_v18, %v120_v17 }
 0x18e   :  { %v232_v20 = vpop.f32.mrf.mxu1 }
 0x18f   :  { %200 = vst.msk [vmem:[#allocation3] sm:$0x1] %vm199_vm5, %v196_v19 }
 0x190   :  { %249 = shalt.err (!%p246_p4)
}
 0x191   :  { %210 = dma.vmem_to_hbm [thread:$0]  %s208_s4, 16, %s317_s5, [#allocation4]  }
 0x192   :  { %258 = dma.done.wait [#allocation4], 16  }
 0x193   :  { %259 = vsyncadd [#allocation4], 4294967280 }
 0x194   :  { %214 = vsyncpa [#allocation4], 1 }

</bundles_post_ra>
